<compile_context>
chip_gen: v7x
topology: tpu7x:2x2x1
jax: 0.10.0
libtpu: 0.0.40
codegen_flags: <defaults>
</compile_context>

<pallas_src>
import functools

import jax
import jax.numpy as jnp
from jax.experimental import pallas as pl
from jax.experimental.pallas import tpu as pltpu


LANE = 128
SUBLANE = 8
_MiB = 1 << 20


def _round_up(n, m):
    return ((n + m - 1) // m) * m


def _feature_pad_dim(dim):
    # v6e's MXU is 2x256x256: use 256-wide K/N tiles when the dim is big
    # enough to fill them; tiny dims just round to one 128-lane tile.
    return _round_up(dim, 256) if dim >= 256 else _round_up(dim, LANE)


def _pad2(a, rows, cols):
    return jnp.pad(a, ((0, rows - a.shape[0]), (0, cols - a.shape[1])))


# ---------------------------------------------------------------------------
# Kernel
# ---------------------------------------------------------------------------
def _encoder_kernel(x_ref, w1_ref, b1_ref, w2_ref, b2_ref, w3_ref, b3_ref,
                    out_ref, *, lat_p):
    # fc1 + SiLU (bf16 MXU operands, f32 accumulate, f32 activation).
    h = jnp.dot(x_ref[...], w1_ref[...],
                preferred_element_type=jnp.float32) + b1_ref[...]
    h = h * jax.nn.sigmoid(h)

    # fc2 + SiLU.
    h = jnp.dot(h.astype(w2_ref.dtype), w2_ref[...],
                preferred_element_type=jnp.float32) + b2_ref[...]
    h = h * jax.nn.sigmoid(h)

    # Fused heads: one MXU matmul producing [mean | logvar]; eps is already
    # folded into the logvar half of b3 on the host.
    heads = jnp.dot(h.astype(w3_ref.dtype), w3_ref[...],
                    preferred_element_type=jnp.float32) + b3_ref[...]

    # Single fused output [mean | exp(logvar)]: exp runs on the EUP (its own
    # bundle slot, effectively free) over all lanes and a lane-wise select
    # keeps the raw mean half, so the write is ONE unmasked, lane-dense store
    # and one output DMA stream instead of two.
    col = jax.lax.broadcasted_iota(jnp.int32, heads.shape, 1)
    fused = jnp.where(col < lat_p, heads, jnp.exp(heads))
    out_ref[...] = fused.astype(out_ref.dtype)


# ---------------------------------------------------------------------------
# One-time parameter preparation (hoisted out of the per-call path)
# ---------------------------------------------------------------------------
def prepare_params(params, *, eps=1e-8, matmul_dtype=jnp.bfloat16):
    """Pad / cast / fuse the Encoder weights once; reuse across forward calls.

    params: dict with w1 (D,h1), b1 (1,h1), w2 (h1,h2), b2 (1,h2),
            w31 (h2,L), b31 (1,L), w32 (h2,L), b32 (1,L)
            (nn.Linear weights already transposed to (in, out)).
    Returns a dict of lane-padded, bf16-cast weights with the two head
    projections fused into a single [mean | logvar] matrix and eps folded
    into the logvar bias, plus shape metadata.
    """
    D, h1 = params["w1"].shape
    h2 = params["w2"].shape[1]
    latent = params["w31"].shape[1]

    d_p = _feature_pad_dim(D)
    h1_p = _feature_pad_dim(h1)
    h2_p = _feature_pad_dim(h2)
    lat_p = _feature_pad_dim(latent)

    w1 = _pad2(params["w1"], d_p, h1_p).astype(matmul_dtype)
    b1 = _pad2(params["b1"], 1, h1_p).astype(jnp.float32)
    w2 = _pad2(params["w2"], h1_p, h2_p).astype(matmul_dtype)
    b2 = _pad2(params["b2"], 1, h2_p).astype(jnp.float32)
    w3 = jnp.concatenate(
        [_pad2(params["w31"], h2_p, lat_p),
         _pad2(params["w32"], h2_p, lat_p)], axis=1).astype(matmul_dtype)
    b3 = jnp.concatenate(
        [_pad2(params["b31"], 1, lat_p),
         _pad2(params["b32"] + eps, 1, lat_p)], axis=1).astype(jnp.float32)

    return dict(
        w1=w1, b1=b1, w2=w2, b2=b2, w3=w3, b3=b3,
        dims=dict(input_dim=D, latent_dim=latent,
                  d_p=d_p, h1_p=h1_p, h2_p=h2_p, lat_p=lat_p),
        matmul_dtype=matmul_dtype,
    )


# ---------------------------------------------------------------------------
# Sizing helpers
# ---------------------------------------------------------------------------
def _vmem_capacity_bytes():
    try:
        return int(pltpu.get_tpu_info().vmem_capacity_bytes)
    except Exception:
        return 64 * _MiB  # v7x per-TC capacity = smallest across generations.


def _pick_block_b(B, h1_p, h2_p):
    if B >= 512:
        blk = 256
    elif B >= 16:
        # At least 2 grid steps so the "parallel" batch axis can shard across
        # both TensorCores on v7x (and pipeline in/out DMAs everywhere).
        blk = _round_up(-(-B // 2), SUBLANE)
    else:
        blk = _round_up(max(B, 1), SUBLANE)
    if max(h1_p, h2_p) >= 4096:
        blk = min(blk, 128)  # bound f32 activation temps (v7x: 64 MiB VMEM).
    return max(SUBLANE, _round_up(blk, SUBLANE))


def _vmem_budget_bytes(block_b, d_p, h1_p, h2_p, lat_p, mm_bytes, out_bytes):
    weights = (d_p * h1_p + h1_p * h2_p + h2_p * 2 * lat_p) * mm_bytes  # x1, single-buffered
    biases = (h1_p + h2_p + 2 * lat_p) * 4
    x_io = 2 * block_b * d_p * mm_bytes                # double-buffered input
    out_io = 2 * block_b * 2 * lat_p * out_bytes       # double-buffered output
    temps = 2 * block_b * (h1_p + h2_p + 2 * lat_p) * 4  # f32 activations + slack
    return weights + biases + x_io + out_io + temps


# ---------------------------------------------------------------------------
# Forward
# ---------------------------------------------------------------------------
def encoder_forward(x, prepared, *, block_b=None, out_dtype=jnp.float32,
                    vmem_limit_bytes=None):
    """Encoder forward pass in a single Pallas kernel.

    x:        [B, input_dim] float32.
    prepared: output of prepare_params() (call it once, reuse every step).
    Returns (mean, scale) with scale = exp(logvar), each [B, latent_dim].
    """
    dims = prepared["dims"]
    D, latent = dims["input_dim"], dims["latent_dim"]
    d_p, h1_p = dims["d_p"], dims["h1_p"]
    h2_p, lat_p = dims["h2_p"], dims["lat_p"]
    mm_dtype = prepared["matmul_dtype"]

    B = x.shape[0]
    assert x.shape[1] == D, (x.shape, D)

    if block_b is None:
        block_b = _pick_block_b(B, h1_p, h2_p)
    block_b = max(SUBLANE, _round_up(block_b, SUBLANE))
    b_p = _round_up(B, block_b)

    # Only the activation is padded / cast per call; weights are pre-baked.
    xp = _pad2(x, b_p, d_p).astype(mm_dtype)

    if vmem_limit_bytes is None:
        need = _vmem_budget_bytes(block_b, d_p, h1_p, h2_p, lat_p,
                                  jnp.dtype(mm_dtype).itemsize,
                                  jnp.dtype(out_dtype).itemsize)
        cap = _vmem_capacity_bytes()
        vmem_limit_bytes = int(min(max(int(need * 1.25), 16 * _MiB),
                                   int(cap * 0.9)))

    grid = (b_p // block_b,)

    def batch_spec(cols):
        return pl.BlockSpec((block_b, cols), lambda i: (i, 0))

    # Grid-invariant operands: constant index_map, single-buffered so they are
    # fetched once and don't pay the default 2x double-buffer VMEM cost.
    resident_kw = {}
    if hasattr(pl, "Buffered"):
        resident_kw = dict(pipeline_mode=pl.Buffered(1))

    def resident_spec(shape):
        return pl.BlockSpec(shape, lambda i: (0, 0), **resident_kw)

    kernel = functools.partial(_encoder_kernel, lat_p=lat_p)

    fused = pl.pallas_call(
        kernel,
        out_shape=jax.ShapeDtypeStruct((b_p, 2 * lat_p), out_dtype),
        grid_spec=pltpu.PrefetchScalarGridSpec(
            num_scalar_prefetch=0,
            grid=grid,
            in_specs=[
                batch_spec(d_p),
                resident_spec(prepared["w1"].shape),
                resident_spec(prepared["b1"].shape),
                resident_spec(prepared["w2"].shape),
                resident_spec(prepared["b2"].shape),
                resident_spec(prepared["w3"].shape),
                resident_spec(prepared["b3"].shape),
            ],
            out_specs=batch_spec(2 * lat_p),
        ),
        compiler_params=pltpu.CompilerParams(
            dimension_semantics=("parallel",),
            vmem_limit_bytes=vmem_limit_bytes),
    )(xp, prepared["w1"], prepared["b1"], prepared["w2"], prepared["b2"],
      prepared["w3"], prepared["b3"])

    # Strip batch padding and split the fused [mean | scale] output.
    mean = fused[:B, :latent]
    scale = fused[:B, lat_p:lat_p + latent]
    return mean, scale


# ---------------------------------------------------------------------------
# Synthetic params + reference + demo
# ---------------------------------------------------------------------------
def init_params(key, input_dim, latent_dim, hidden_dim_1, hidden_dim_2):
    """Deterministic synthetic params. Weights stored already transposed to
    (in, out); biases stored as (1, out) for 2-D TPU layout."""
    ks = jax.random.split(key, 8)

    def lin(kw, kb, d_in, d_out):
        bound = 1.0 / jnp.sqrt(d_in)
        w = jax.random.uniform(kw, (d_in, d_out), jnp.float32, -bound, bound)
        b = jax.random.uniform(kb, (1, d_out), jnp.float32, -bound, bound)
        return w, b

    w1, b1 = lin(ks[0], ks[1], input_dim, hidden_dim_1)
    w2, b2 = lin(ks[2], ks[3], hidden_dim_1, hidden_dim_2)
    w31, b31 = lin(ks[4], ks[5], hidden_dim_2, latent_dim)
    w32, b32 = lin(ks[6], ks[7], hidden_dim_2, latent_dim)
    return dict(w1=w1, b1=b1, w2=w2, b2=b2,
                w31=w31, b31=b31, w32=w32, b32=b32)


def _reference(x, params, eps=1e-8, matmul_dtype=jnp.bfloat16):
    """Pure-JAX reference using the same bf16-cast matmul operands as the
    kernel (f32 accumulation), isolating kernel correctness from bf16
    rounding of the weights."""
    cast = lambda a: a.astype(matmul_dtype).astype(jnp.float32)
    silu = lambda v: v * jax.nn.sigmoid(v)
    h = silu(cast(x) @ cast(params["w1"]) + params["b1"])
    h = silu(cast(h) @ cast(params["w2"]) + params["b2"])
    mean = cast(h) @ cast(params["w31"]) + params["b31"]
    logvar = cast(h) @ cast(params["w32"]) + params["b32"] + eps
    return mean, jnp.exp(logvar)


if __name__ == "__main__":
    # Small shapes consistent with the module's __init__ signature.
    batch = 8
    input_dim = 32
    hidden_dim_1 = 64
    hidden_dim_2 = 48
    latent_dim = 16

    key = jax.random.PRNGKey(0)
    kx, kp = jax.random.split(key)
    x = jax.random.normal(kx, (batch, input_dim), jnp.float32)
    params = init_params(kp, input_dim, latent_dim, hidden_dim_1, hidden_dim_2)

    # One-time weight preparation (pad / bf16 cast / head fusion), reused below.
    prepared = prepare_params(params)

    mean, scale = encoder_forward(x, prepared)
    jax.block_until_ready((mean, scale))

    ref_mean, ref_scale = _reference(x, params)
    assert mean.shape == (batch, latent_dim) and scale.shape == (batch, latent_dim)
    assert jnp.allclose(mean, ref_mean, atol=1e-3, rtol=1e-3)
    assert jnp.allclose(scale, ref_scale, atol=1e-3, rtol=1e-3)

    # Second check: ragged batch + multi-step grid (exercises batch padding,
    # grid pipelining, single-buffered weights across steps, slice-back).
    batch2 = 37
    x2 = jax.random.normal(jax.random.PRNGKey(1), (batch2, input_dim), jnp.float32)
    mean2, scale2 = encoder_forward(x2, prepared, block_b=16)
    jax.block_until_ready((mean2, scale2))
    ref_mean2, ref_scale2 = _reference(x2, params)
    assert jnp.allclose(mean2, ref_mean2, atol=1e-3, rtol=1e-3)
    assert jnp.allclose(scale2, ref_scale2, atol=1e-3, rtol=1e-3)

    # The Normal(loc=mean, scale=scale) distribution is fully specified by
    # these two kernel outputs; sampling/log_prob is plain JAX glue.
    print("KERNEL_OK")
</pallas_src>

<mosaic_0001>
module attributes {stable_mosaic.version = 11 : i64} {
  func.func @_encoder_kernel(%arg0: i32, %arg1: memref<8x128xbf16, #tpu.memory_space<vmem>>, %arg2: memref<128x128xbf16, #tpu.memory_space<vmem>>, %arg3: memref<1x128xf32, #tpu.memory_space<vmem>>, %arg4: memref<128x128xbf16, #tpu.memory_space<vmem>>, %arg5: memref<1x128xf32, #tpu.memory_space<vmem>>, %arg6: memref<128x256xbf16, #tpu.memory_space<vmem>>, %arg7: memref<1x256xf32, #tpu.memory_space<vmem>>, %arg8: memref<8x256xf32, #tpu.memory_space<vmem>>) attributes {dimension_semantics = [#tpu.dimension_semantics<parallel>], iteration_bounds = array<i64: 1>, scalar_prefetch = 0 : i64, scratch_operands = 0 : i64, tpu.core_type = #tpu.core_type<tc>, window_params = [{transform_indices = @transform_0, window_bounds = array<i64: 8, 128>}, {pipeline_mode = #tpu.pipeline_mode<synchronous>, transform_indices = @transform_1, window_bounds = array<i64: 128, 128>}, {pipeline_mode = #tpu.pipeline_mode<synchronous>, transform_indices = @transform_2, window_bounds = array<i64: 1, 128>}, {pipeline_mode = #tpu.pipeline_mode<synchronous>, transform_indices = @transform_3, window_bounds = array<i64: 128, 128>}, {pipeline_mode = #tpu.pipeline_mode<synchronous>, transform_indices = @transform_4, window_bounds = array<i64: 1, 128>}, {pipeline_mode = #tpu.pipeline_mode<synchronous>, transform_indices = @transform_5, window_bounds = array<i64: 128, 256>}, {pipeline_mode = #tpu.pipeline_mode<synchronous>, transform_indices = @transform_6, window_bounds = array<i64: 1, 256>}, {transform_indices = @transform_7, window_bounds = array<i64: 8, 256>}]} {
    %c0 = arith.constant 0 : index
    %c0_0 = arith.constant 0 : index
    %0 = vector.load %arg1[%c0, %c0_0] : memref<8x128xbf16, #tpu.memory_space<vmem>>, vector<8x128xbf16>
    %c0_1 = arith.constant 0 : index
    %c0_2 = arith.constant 0 : index
    %1 = vector.load %arg2[%c0_1, %c0_2] : memref<128x128xbf16, #tpu.memory_space<vmem>>, vector<128x128xbf16>
    %cst = arith.constant dense<0.000000e+00> : vector<8x128xf32>
    %2 = tpu.matmul %0, %1, %cst {dimension_numbers = #tpu.dot_dimension_numbers<[1], [0], [0], [1], [0, 0, 1, 1], [], []>} : vector<8x128xbf16>, vector<128x128xbf16>, vector<8x128xf32> -> vector<8x128xf32>
    %c0_3 = arith.constant 0 : index
    %c0_4 = arith.constant 0 : index
    %3 = vector.load %arg3[%c0_3, %c0_4] : memref<1x128xf32, #tpu.memory_space<vmem>>, vector<1x128xf32>
    %4 = vector.broadcast %3 : vector<1x128xf32> to vector<8x128xf32>
    %5 = arith.addf %2, %4 : vector<8x128xf32>
    %6 = arith.negf %5 : vector<8x128xf32>
    %7 = math.exp %6 : vector<8x128xf32>
    %cst_5 = arith.constant 1.000000e+00 : f32
    %8 = vector.broadcast %cst_5 : f32 to vector<8x128xf32>
    %9 = arith.addf %8, %7 : vector<8x128xf32>
    %10 = arith.divf %8, %9 : vector<8x128xf32>
    %11 = arith.mulf %5, %10 : vector<8x128xf32>
    %12 = arith.truncf %11 : vector<8x128xf32> to vector<8x128xbf16>
    %c0_6 = arith.constant 0 : index
    %c0_7 = arith.constant 0 : index
    %13 = vector.load %arg4[%c0_6, %c0_7] : memref<128x128xbf16, #tpu.memory_space<vmem>>, vector<128x128xbf16>
    %cst_8 = arith.constant dense<0.000000e+00> : vector<8x128xf32>
    %14 = tpu.matmul %12, %13, %cst_8 {dimension_numbers = #tpu.dot_dimension_numbers<[1], [0], [0], [1], [0, 0, 1, 1], [], []>} : vector<8x128xbf16>, vector<128x128xbf16>, vector<8x128xf32> -> vector<8x128xf32>
    %c0_9 = arith.constant 0 : index
    %c0_10 = arith.constant 0 : index
    %15 = vector.load %arg5[%c0_9, %c0_10] : memref<1x128xf32, #tpu.memory_space<vmem>>, vector<1x128xf32>
    %16 = vector.broadcast %15 : vector<1x128xf32> to vector<8x128xf32>
    %17 = arith.addf %14, %16 : vector<8x128xf32>
    %18 = arith.negf %17 : vector<8x128xf32>
    %19 = math.exp %18 : vector<8x128xf32>
    %cst_11 = arith.constant 1.000000e+00 : f32
    %20 = vector.broadcast %cst_11 : f32 to vector<8x128xf32>
    %21 = arith.addf %20, %19 : vector<8x128xf32>
    %22 = arith.divf %20, %21 : vector<8x128xf32>
    %23 = arith.mulf %17, %22 : vector<8x128xf32>
    %24 = arith.truncf %23 : vector<8x128xf32> to vector<8x128xbf16>
    %c0_12 = arith.constant 0 : index
    %c0_13 = arith.constant 0 : index
    %25 = vector.load %arg6[%c0_12, %c0_13] : memref<128x256xbf16, #tpu.memory_space<vmem>>, vector<128x256xbf16>
    %cst_14 = arith.constant dense<0.000000e+00> : vector<8x256xf32>
    %26 = tpu.matmul %24, %25, %cst_14 {dimension_numbers = #tpu.dot_dimension_numbers<[1], [0], [0], [1], [0, 0, 1, 1], [], []>} : vector<8x128xbf16>, vector<128x256xbf16>, vector<8x256xf32> -> vector<8x256xf32>
    %c0_15 = arith.constant 0 : index
    %c0_16 = arith.constant 0 : index
    %27 = vector.load %arg7[%c0_15, %c0_16] : memref<1x256xf32, #tpu.memory_space<vmem>>, vector<1x256xf32>
    %28 = vector.broadcast %27 : vector<1x256xf32> to vector<8x256xf32>
    %29 = arith.addf %26, %28 : vector<8x256xf32>
    %30 = tpu.iota {dimensions = array<i32: 1>} : vector<8x256xi32>
    %c128_i32 = arith.constant 128 : i32
    %31 = vector.broadcast %c128_i32 : i32 to vector<8x256xi32>
    %32 = arith.cmpi slt, %30, %31 : vector<8x256xi32>
    %33 = math.exp %29 : vector<8x256xf32>
    %34 = arith.select %32, %29, %33 : vector<8x256xi1>, vector<8x256xf32>
    %c0_17 = arith.constant 0 : index
    %c0_18 = arith.constant 0 : index
    %35 = vector.load %arg8[%c0_17, %c0_18] : memref<8x256xf32, #tpu.memory_space<vmem>>, vector<8x256xf32>
    tpu.vector_store %arg8[%c0_17, %c0_18], %34 {strides = array<i32>} : memref<8x256xf32, #tpu.memory_space<vmem>>, vector<8x256xf32>,
    return
  }
  func.func @transform_0(%arg0: i32) -> (i32, i32) {
    %c0_i32 = arith.constant 0 : i32
    %c0_i32_0 = arith.constant 0 : i32
    return %arg0, %c0_i32 : i32, i32
  }
  func.func @transform_1(%arg0: i32) -> (i32, i32) {
    %c0_i32 = arith.constant 0 : i32
    %c0_i32_0 = arith.constant 0 : i32
    %c0_i32_1 = arith.constant 0 : i32
    return %c0_i32, %c0_i32_0 : i32, i32
  }
  func.func @transform_2(%arg0: i32) -> (i32, i32) {
    %c0_i32 = arith.constant 0 : i32
    %c0_i32_0 = arith.constant 0 : i32
    %c0_i32_1 = arith.constant 0 : i32
    return %c0_i32, %c0_i32_0 : i32, i32
  }
  func.func @transform_3(%arg0: i32) -> (i32, i32) {
    %c0_i32 = arith.constant 0 : i32
    %c0_i32_0 = arith.constant 0 : i32
    %c0_i32_1 = arith.constant 0 : i32
    return %c0_i32, %c0_i32_0 : i32, i32
  }
  func.func @transform_4(%arg0: i32) -> (i32, i32) {
    %c0_i32 = arith.constant 0 : i32
    %c0_i32_0 = arith.constant 0 : i32
    %c0_i32_1 = arith.constant 0 : i32
    return %c0_i32, %c0_i32_0 : i32, i32
  }
  func.func @transform_5(%arg0: i32) -> (i32, i32) {
    %c0_i32 = arith.constant 0 : i32
    %c0_i32_0 = arith.constant 0 : i32
    %c0_i32_1 = arith.constant 0 : i32
    return %c0_i32, %c0_i32_0 : i32, i32
  }
  func.func @transform_6(%arg0: i32) -> (i32, i32) {
    %c0_i32 = arith.constant 0 : i32
    %c0_i32_0 = arith.constant 0 : i32
    %c0_i32_1 = arith.constant 0 : i32
    return %c0_i32, %c0_i32_0 : i32, i32
  }
  func.func @transform_7(%arg0: i32) -> (i32, i32) {
    %c0_i32 = arith.constant 0 : i32
    %c0_i32_0 = arith.constant 0 : i32
    return %arg0, %c0_i32 : i32, i32
  }
}

</mosaic_0001>

<bundles_post_ra>
// kernel: tpu_custom_call.1
= control target key start
LH: loop header
LB: loop body
LE: loop exit
PB: predicated region body
PF: predicated region fallthrough
CT: control target
= control target key end

     0   :  { %12 = vsyncpa [#allocation3], 0  ;;  %s900_s0 = inlined_call_operand.hbm [shape: bf16[8,128], index: 0, kind: input, shape index: {}]   ;;  %s901_s1 = inlined_call_operand.hbm [shape: bf16[128,128], index: 1, kind: input, shape index: {}]   ;;  %s902_s2 = inlined_call_operand.vmem [shape: f32[1,128], index: 2, kind: input, shape index: {}]   ;;  %s903_s3 = inlined_call_operand.hbm [shape: bf16[128,128], index: 3, kind: input, shape index: {}]   ;;  %s904_s4 = inlined_call_operand.vmem [shape: f32[1,128], index: 4, kind: input, shape index: {}]   ;;  %s905_s5 = inlined_call_operand.hbm [shape: bf16[128,256], index: 5, kind: input, shape index: {}]   ;;  %s906_s6 = inlined_call_operand.vmem [shape: f32[1,256], index: 6, kind: input, shape index: {}]   ;;  %s907_s7 = inlined_call_operand.hbm [shape: f32[8,256], index: 7, kind: output, shape index: {}]  }
   0x1   :  { %13 = vsyncpa [#allocation6], 0 }
   0x2   :  { %14 = vsyncpa [#allocation9], 0 }
   0x3   :  { %15 = vsyncpa [#allocation4], 0  ;;  %s773_s24 = smov [#allocation5]   ;;  %s655_s28 = scalar_lea.hbm %s901_s1, 1024 }
   0x4   :  { %s31_s25 = sshll.u32 %s773_s24, 4  ;;  %p656_p0 = scmp.ne.s32.totalorder %s901_s1, %s655_s28  ;;  %s32_s25 = int_to_ptr.vmem [resolvable:$true] %s31_s25 }
   0x5   :  { %p659_p1 = scmp.lt.u32.totalorder %s655_s28, %s901_s1 }
   0x7   :  { %p661_p2 = pnand %p659_p1, %p656_p0 }
   0x9   :  { %664 = shalt.err (!%p661_p2)
}
   0xa   :  { %s665_s10 = scalar_lea.vmem %s32_s25, 1024  ;;  %p670_p4 = scmp.lt.s32.totalorder %s32_s25, %s32_s25 }
   0xb   :  { %p666_p3 = scmp.ne.s32.totalorder %s32_s25, %s665_s10  ;;  %p671_p5 = scmp.lt.s32.totalorder %s665_s10, %s665_s10 }
   0xd   :  { %p672_p6 = por %p671_p5, %p670_p4 }
   0xf   :  { %p673_p7 = pnand %p672_p6, %p666_p3 }
  0x11   :  { %676 = shalt.err (!%p673_p7)
}
  0x12   :  { %s774_s11 = smov 64   ;;  %s775_s12 = smov 4  }
  0x13   :  { %37 = dma.hbm_to_vmem [thread:$0]  %s901_s1, 1024, %s32_s25, [#allocation6], %s774_s11, %s774_s11, %s775_s12  }
  0x14   :  { %s776_s15 = smov [#allocation2]   ;;  %s777_s17 = smov [#allocation7]  }
  0x15   :  { %s22_s16 = sshll.u32 %s776_s15, 4  ;;  %s45_s18 = sshll.u32 %s777_s17, 4  ;;  %s23_s16 = int_to_ptr.vmem [resolvable:$true] %s22_s16  ;;  %s46_s18 = int_to_ptr.vmem [resolvable:$true] %s45_s18 }
  0x16   :  { %s677_s21 = scalar_lea.hbm %s900_s0, 64 }
  0x17   :  { %p678_p8 = scmp.ne.s32.totalorder %s900_s0, %s677_s21  ;;  %p681_p9 = scmp.lt.u32.totalorder %s677_s21, %s900_s0 }
  0x19   :  { %p683_p10 = pnand %p681_p9, %p678_p8 }
  0x1b   :  { %686 = shalt.err (!%p683_p10)
}
  0x1c   :  { %s687_s1 = scalar_lea.vmem %s23_s16, 64  ;;  %p692_p12 = scmp.lt.s32.totalorder %s23_s16, %s23_s16 }
  0x1d   :  { %p688_p11 = scmp.ne.s32.totalorder %s23_s16, %s687_s1  ;;  %p693_p13 = scmp.lt.s32.totalorder %s687_s1, %s687_s1 }
  0x1f   :  { %p694_p0 = por %p693_p13, %p692_p12 }
  0x21   :  { %p695_p1 = pnand %p694_p0, %p688_p11 }
  0x23   :  { %698 = shalt.err (!%p695_p1)
}
  0x24   :  { %25 = dma.hbm_to_vmem [thread:$0]  %s900_s0, 64, %s23_s16, [#allocation3]  }
  0x25   :  { %s699_s30 = scalar_lea.hbm %s903_s3, 1024 }
  0x26   :  { %p700_p2 = scmp.ne.s32.totalorder %s903_s3, %s699_s30  ;;  %p703_p3 = scmp.lt.u32.totalorder %s699_s30, %s903_s3 }
  0x28   :  { %p705_p4 = pnand %p703_p3, %p700_p2 }
  0x2a   :  { %708 = shalt.err (!%p705_p4)
}
  0x2b   :  { %s709_s14 = scalar_lea.vmem %s46_s18, 1024  ;;  %p714_p6 = scmp.lt.s32.totalorder %s46_s18, %s46_s18 }
  0x2c   :  { %p710_p5 = scmp.ne.s32.totalorder %s46_s18, %s709_s14  ;;  %p715_p7 = scmp.lt.s32.totalorder %s709_s14, %s709_s14 }
  0x2e   :  { %p716_p8 = por %p715_p7, %p714_p6 }
  0x30   :  { %p717_p9 = pnand %p716_p8, %p710_p5 }
  0x32   :  { %720 = shalt.err (!%p717_p9)
}
  0x33   :  { %51 = dma.hbm_to_vmem [thread:$0]  %s903_s3, 1024, %s46_s18, [#allocation6], %s774_s11, %s774_s11, %s775_s12  }
  0x34   :  { %s778_s16 = smov [#allocation8]   ;;  %s721_s21 = scalar_lea.hbm %s905_s5, 2048 }
  0x35   :  { %s59_s17 = sshll.u32 %s778_s16, 4  ;;  %p722_p10 = scmp.ne.s32.totalorder %s905_s5, %s721_s21  ;;  %s60_s17 = int_to_ptr.vmem [resolvable:$true] %s59_s17 }
  0x36   :  { %p725_p11 = scmp.lt.u32.totalorder %s721_s21, %s905_s5 }
  0x38   :  { %p727_p12 = pnand %p725_p11, %p722_p10 }
  0x3a   :  { %730 = shalt.err (!%p727_p12)
}
  0x3b   :  { %s731_s1 = scalar_lea.vmem %s60_s17, 2048  ;;  %p736_p0 = scmp.lt.s32.totalorder %s60_s17, %s60_s17 }
  0x3c   :  { %p732_p13 = scmp.ne.s32.totalorder %s60_s17, %s731_s1  ;;  %p737_p1 = scmp.lt.s32.totalorder %s731_s1, %s731_s1 }
  0x3e   :  { %p738_p2 = por %p737_p1, %p736_p0 }
  0x40   :  { %p739_p3 = pnand %p738_p2, %p732_p13 }
  0x42   :  { %742 = shalt.err (!%p739_p3)
}
  0x43   :  { %s779_s3 = smov 128   ;;  %s780_s11 = smov 8  }
  0x44   :  { %65 = dma.hbm_to_vmem [thread:$0]  %s905_s5, 2048, %s60_s17, [#allocation9], %s779_s3, %s779_s3, %s780_s11  }
  0x45   :  { %765 = dma.done.wait [#allocation3], 64  }
  0x46   :  { %766 = vsyncadd [#allocation3], 4294967232 }
  0x47   :  { %767 = dma.done.wait [#allocation6], 2048  }
  0x48   :  { %768 = vsyncadd [#allocation6], 4294965248 }
  0x49   :  { %769 = dma.done.wait [#allocation9], 2048  }
  0x4a   :  { %770 = vsyncadd [#allocation9], 4294965248  ;;  %v781_v0 = vmov 0.0   ;;  %vm782_vm0 = vmmov 0   ;;  %v605_v1 = vld [vmem:[#allocation5] sm:$0xff]   ;;  %v606_v2 = vld [vmem:[#allocation5 + $0x8] sm:$0xff]   ;;  %v338_v59 = vlaneseq }
  0x4b   :  { %553 = vmatprep.subr.bf16.mxu0 %v781_v0  ;;  %569 = vmatprep.mubr.msk.bf16.mxu0 %vm782_vm0, %v781_v0  ;;  %v607_v3 = vld [vmem:[#allocation5 + $0x10] sm:$0xff]   ;;  %v608_v4 = vld [vmem:[#allocation5 + $0x18] sm:$0xff]   ;;  %v609_v5 = vld [vmem:[#allocation5 + $0x20] sm:$0xff]   ;;  %v783_v46 = vmov 0  }
  0x4c   :  { %573 = vmatprep.subr.bf16.mxu1 %v781_v0  ;;  %589 = vmatprep.mubr.msk.bf16.mxu1 %vm782_vm0, %v781_v0  ;;  %v610_v6 = vld [vmem:[#allocation5 + $0x28] sm:$0xff]   ;;  %v611_v7 = vld [vmem:[#allocation5 + $0x30] sm:$0xff]   ;;  %v612_v8 = vld [vmem:[#allocation5 + $0x38] sm:$0xff]   ;;  %v339_v60 = vshrl.u32 %v338_v59, 7 }
  0x4d   :  { %554 = vmatpush3.bf16.msra.mxu0 %v605_v1  ;;  %v81_v9 = vld [vmem:[#allocation2] sm:$0xf]  ;;  %v613_v10 = vld [vmem:[#allocation7] sm:$0xff]   ;;  %v614_v11 = vld [vmem:[#allocation7 + $0x8] sm:$0xff]  }
  0x4e   :  { %555 = vmatprep.subr.bf16.mxu0 %v781_v0  ;;  %574 = vmatpush3.bf16.msra.mxu1 %v613_v10  ;;  %v615_v12 = vld [vmem:[#allocation7 + $0x10] sm:$0xff]   ;;  %v616_v13 = vld [vmem:[#allocation7 + $0x18] sm:$0xff]   ;;  %v617_v14 = vld [vmem:[#allocation7 + $0x20] sm:$0xff]   ;;  %v340_v61 = vsub.s32 0, %v339_v60  ;;  %v344_v63 = vsub.s32 1, %v339_v60 }
  0x4f   :  { %575 = vmatprep.subr.bf16.mxu1 %v781_v0  ;;  %v618_v15 = vld [vmem:[#allocation7 + $0x28] sm:$0xff]   ;;  %v619_v16 = vld [vmem:[#allocation7 + $0x30] sm:$0xff]   ;;  %v620_v17 = vld [vmem:[#allocation7 + $0x38] sm:$0xff]  }
  0x50   :  { %v499_v18 = vld [vmem:[%s902_s2] ss:$0 sm:$0xff]  ;;  %v623_v30 = vld [vmem:[#allocation8 + $0x4] ss:$8 sps:$4 sm:$0xff]   ;;  %v621_v31 = vld [vmem:[#allocation8] ss:$8 sps:$4 sm:$0xff]  }
  0x51   :  { %556 = vmatpush3.bf16.msra.mxu0 %v606_v2  ;;  %v626_v32 = vld [vmem:[#allocation8 + $0x14] ss:$8 sps:$4 sm:$0xff]   ;;  %v624_v33 = vld [vmem:[#allocation8 + $0x10] ss:$8 sps:$4 sm:$0xff]   ;;  %v629_v34 = vld [vmem:[#allocation8 + $0x24] ss:$8 sps:$4 sm:$0xff]  }
  0x52   :  { %557 = vmatprep.subr.bf16.mxu0 %v781_v0  ;;  %576 = vmatpush3.bf16.msra.mxu1 %v614_v11  ;;  %v627_v35 = vld [vmem:[#allocation8 + $0x20] ss:$8 sps:$4 sm:$0xff]   ;;  %v632_v36 = vld [vmem:[#allocation8 + $0x34] ss:$8 sps:$4 sm:$0xff]   ;;  %v630_v37 = vld [vmem:[#allocation8 + $0x30] ss:$8 sps:$4 sm:$0xff]  }
  0x53   :  { %577 = vmatprep.subr.bf16.mxu1 %v781_v0  ;;  %v635_v38 = vld [vmem:[#allocation8 + $0x44] ss:$8 sps:$4 sm:$0xff]   ;;  %v633_v39 = vld [vmem:[#allocation8 + $0x40] ss:$8 sps:$4 sm:$0xff]   ;;  %v638_v40 = vld [vmem:[#allocation8 + $0x54] ss:$8 sps:$4 sm:$0xff]  }
  0x54   :  { %v636_v41 = vld [vmem:[#allocation8 + $0x50] ss:$8 sps:$4 sm:$0xff]   ;;  %v641_v42 = vld [vmem:[#allocation8 + $0x64] ss:$8 sps:$4 sm:$0xff]   ;;  %v639_v43 = vld [vmem:[#allocation8 + $0x60] ss:$8 sps:$4 sm:$0xff]  }
  0x55   :  { %558 = vmatpush3.bf16.msra.mxu0 %v607_v3  ;;  %v644_v44 = vld [vmem:[#allocation8 + $0x74] ss:$8 sps:$4 sm:$0xff]   ;;  %v642_v45 = vld [vmem:[#allocation8 + $0x70] ss:$8 sps:$4 sm:$0xff]  }
  0x56   :  { %559 = vmatprep.subr.bf16.mxu0 %v781_v0  ;;  %578 = vmatpush3.bf16.msra.mxu1 %v615_v12  ;;  %v509_v47 = vld [vmem:[%s904_s4] ss:$0 sm:$0xff]  ;;  %s784_s4 = smov [#allocation10]  }
  0x57   :  { %579 = vmatprep.subr.bf16.mxu1 %v781_v0  ;;  %v336_v62 = vld [vmem:[%s906_s6] sm:$0x3]  ;;  %s488_s30 = sshll.u32 %s784_s4, 4  ;;  %s489_s30 = int_to_ptr.vmem [resolvable:$true] %s488_s30 }
  0x58   :  { %v345_v1 = vrot.slane %v336_v62, %v344_v63  ;;  %s743_s8 = scalar_lea.vmem %s489_s30, 256  ;;  %p748_p5 = scmp.lt.s32.totalorder %s489_s30, %s489_s30 }
  0x59   :  { %560 = vmatpush3.bf16.msra.mxu0 %v608_v4  ;;  %p744_p4 = scmp.ne.s32.totalorder %s489_s30, %s743_s8  ;;  %p749_p6 = scmp.lt.s32.totalorder %s743_s8, %s743_s8 }
  0x5a   :  { %561 = vmatprep.subr.bf16.mxu0 %v781_v0  ;;  %580 = vmatpush3.bf16.msra.mxu1 %v616_v13 }
  0x5b   :  { %581 = vmatprep.subr.bf16.mxu1 %v781_v0  ;;  %p750_p7 = por %p749_p6, %p748_p5 }
  0x5d   :  { %562 = vmatpush3.bf16.msra.mxu0 %v609_v5  ;;  %p751_p8 = pnand %p750_p7, %p744_p4 }
  0x5e   :  { %563 = vmatprep.subr.bf16.mxu0 %v781_v0  ;;  %582 = vmatpush3.bf16.msra.mxu1 %v617_v14 }
  0x5f   :  { %583 = vmatprep.subr.bf16.mxu1 %v781_v0 }
  0x61   :  { %564 = vmatpush3.bf16.msra.mxu0 %v610_v6 }
  0x62   :  { %565 = vmatprep.subr.bf16.mxu0 %v781_v0  ;;  %584 = vmatpush3.bf16.msra.mxu1 %v618_v15 }
  0x63   :  { %585 = vmatprep.subr.bf16.mxu1 %v781_v0 }
  0x65   :  { %566 = vmatpush3.bf16.msra.mxu0 %v611_v7 }
  0x66   :  { %567 = vmatprep.subr.bf16.mxu0 %v781_v0  ;;  %586 = vmatpush3.bf16.msra.mxu1 %v619_v16 }
  0x67   :  { %587 = vmatprep.subr.bf16.mxu1 %v781_v0  ;;  %v341_v0 = vrot.slane %v336_v62, %v340_v61 }
  0x69   :  { %568 = vmatpush3.bf16.msra.mxu0 %v612_v8 }
  0x6a   :  { %588 = vmatpush3.bf16.msra.mxu1 %v620_v17  ;;  %428 = vmatprep.subr.bf16.mxu0 %v623_v30 }
  0x6c   :  { %570 = vmatmul.mubr.bf16.vlgmr.msra.gmra.mrb[0].mxu0 %v81_v9 }
  0x6d   :  { %429 = vmatpush1.bf16.msra.mxu0 %v621_v31  ;;  %460 = vmatprep.mubr.bf16.mxu0 %v783_v46 }
  0x6e   :  { %430 = vmatprep.subr.bf16.mxu0 %v626_v32 }
  0x71   :  { %431 = vmatpush1.bf16.msra.mxu0 %v624_v33 }
  0x72   :  { %432 = vmatprep.subr.bf16.mxu0 %v629_v34 }
  0x75   :  { %433 = vmatpush1.bf16.msra.mxu0 %v627_v35 }
  0x76   :  { %434 = vmatprep.subr.bf16.mxu0 %v632_v36 }
  0x79   :  { %435 = vmatpush1.bf16.msra.mxu0 %v630_v37 }
  0x7a   :  { %436 = vmatprep.subr.bf16.mxu0 %v635_v38 }
  0x7d   :  { %437 = vmatpush1.bf16.msra.mxu0 %v633_v39 }
  0x7e   :  { %438 = vmatprep.subr.bf16.mxu0 %v638_v40 }
  0x81   :  { %439 = vmatpush1.bf16.msra.mxu0 %v636_v41 }
  0x82   :  { %440 = vmatprep.subr.bf16.mxu0 %v641_v42 }
  0x85   :  { %441 = vmatpush1.bf16.msra.mxu0 %v639_v43 }
  0x86   :  { %442 = vmatprep.subr.bf16.mxu0 %v644_v44 }
  0x89   :  { %443 = vmatpush1.bf16.msra.mxu0 %v642_v45 }
 0x13f   :  { %v187_v19 = vpop.f32.mrb[0].mxu0 }
 0x140   :  { %v188_v20 = vadd.f32 %v499_v18, %v187_v19  ;;  %v571_v21 = vpop.f32.mrb[1].mxu0 }
 0x141   :  { %v190_v22 = vpop.f32.mrb[2].mxu0 }
 0x142   :  { %v508_v23 = vmul.f32 -1.442695, %v188_v20  ;;  %v572_v24 = vpop.f32.mrb[3].mxu0 }
 0x144   :  { %645 = vpow2.f32 %v508_v23 }
 0x14e   :  { %v646_v25 = vpop.eup %645 }
 0x14f   :  { %v196_v26 = vadd.f32 1.0, %v646_v25 }
 0x151   :  { %647 = vrcp.f32 %v196_v26 }
 0x15b   :  { %v648_v27 = vpop.eup %647 }
 0x15c   :  { %v199_v28 = vmul.f32 %v648_v27, %v188_v20 }
 0x15e   :  { %v200_v29 = vpack.c.bf16 %v199_v28, %v199_v28 }
 0x160   :  { %590 = vmatmul.mubr.bf16.vlgmr.msra.gmra.mrb[0].mxu1 %v200_v29 }
 0x233   :  { %v306_v48 = vpop.f32.mrb[0].mxu1 }
 0x234   :  { %v307_v49 = vadd.f32 %v509_v47, %v306_v48  ;;  %v591_v50 = vpop.f32.mrb[1].mxu1 }
 0x235   :  { %v309_v51 = vpop.f32.mrb[2].mxu1 }
 0x236   :  { %v518_v52 = vmul.f32 -1.442695, %v307_v49  ;;  %v592_v53 = vpop.f32.mrb[3].mxu1 }
 0x238   :  { %649 = vpow2.f32 %v518_v52 }
 0x242   :  { %v650_v54 = vpop.eup %649 }
 0x243   :  { %v315_v55 = vadd.f32 1.0, %v650_v54 }
 0x245   :  { %651 = vrcp.f32 %v315_v55 }
 0x24f   :  { %v652_v56 = vpop.eup %651 }
 0x250   :  { %v318_v57 = vmul.f32 %v652_v56, %v307_v49 }
 0x252   :  { %v319_v58 = vpack.c.bf16 %v318_v57, %v318_v57 }
 0x254   :  { %461 = vmatmul.mubr.bf16.vlgmr.msra.gmra.mrb[4].mxu0 %v319_v58 }
 0x327   :  { %v462_v2 = vpop.f32.mrb[4].mxu0 }
 0x328   :  { %v463_v3 = vadd.f32 %v462_v2, %v341_v0  ;;  %v464_v4 = vpop.f32.mrb[5].mxu0 }
 0x329   :  { %v465_v5 = vadd.f32 %v464_v4, %v345_v1  ;;  %v466_v6 = vpop.f32.mrb[6].mxu0 }
 0x32a   :  { %480 = vst [vmem:[#allocation10] sm:$0xff] %v463_v3  ;;  %v467_v7 = vpop.f32.mrb[7].mxu0 }
 0x32b   :  { %v476_v8 = vmul.f32 1.442695, %v465_v5 }
 0x32d   :  { %653 = vpow2.f32 %v476_v8 }
 0x337   :  { %v654_v9 = vpop.eup %653 }
 0x338   :  { %481 = vst [vmem:[#allocation10 + $0x8] sm:$0xff] %v654_v9 }
 0x339   :  { %754 = shalt.err (!%p751_p8)
}
 0x33a   :  { %s755_s10 = scalar_lea.hbm %s907_s7, 256 }
 0x33b   :  { %p756_p9 = scmp.ne.s32.totalorder %s907_s7, %s755_s10  ;;  %p759_p10 = scmp.lt.u32.totalorder %s755_s10, %s907_s7 }
 0x33d   :  { %p761_p11 = pnand %p759_p10, %p756_p9 }
 0x33f   :  { %764 = shalt.err (!%p761_p11)
}
 0x340   :  { %491 = dma.vmem_to_hbm [thread:$0]  %s489_s30, 256, %s907_s7, [#allocation4]  }
 0x341   :  { %771 = dma.done.wait [#allocation4], 256  }
 0x342   :  { %772 = vsyncadd [#allocation4], 4294967040 }
 0x343   :  { %495 = vsyncpa [#allocation3], 1 }
 0x344   :  { %496 = vsyncpa [#allocation6], 1 }
 0x345   :  { %497 = vsyncpa [#allocation9], 1 }
 0x346   :  { %498 = vsyncpa [#allocation4], 1 }

</bundles_post_ra>
